<compile_context>
chip_gen: v7x
topology: tpu7x:2x2x1
jax: 0.10.0
libtpu: 0.0.40
codegen_flags: <defaults>
</compile_context>

<pallas_src>
import functools

import jax
import jax.numpy as jnp
from jax.experimental import pallas as pl
from jax.experimental.pallas import tpu as pltpu

_LANE = 128
_SUBLANE = 8


def _round_up(x, m):
    return ((x + m - 1) // m) * m


def _erf_f32(x):
    # Abramowitz & Stegun 7.1.26 rational approximation of erf.
    # |abs error| <= 1.5e-7 (exact at f32 test tolerance); uses only
    # mul/add/exp so it lowers cleanly in Mosaic.  Matches nn.GELU default
    # (approximate='none') semantics.
    a1 = 0.254829592
    a2 = -0.284496736
    a3 = 1.421413741
    a4 = -1.453152027
    a5 = 1.061405429
    p = 0.3275911
    sign = jnp.where(x < 0.0, -1.0, 1.0)
    ax = jnp.abs(x)
    t = 1.0 / (1.0 + p * ax)
    poly = ((((a5 * t + a4) * t + a3) * t + a2) * t + a1) * t
    y = 1.0 - poly * jnp.exp(-ax * ax)
    return sign * y


def _gelu_exact(x):
    return 0.5 * x * (1.0 + _erf_f32(x * 0.7071067811865475))


def _mlp_kernel(*args, layer_meta):
    """Fused MLP over one activation row-tile.

    args = (x_ref, [w, b, (gamma, beta if norm)] per layer ..., o_ref)
    layer_meta = tuple of (valid_d_out, use_norm) per layer (static).
    """
    x_ref = args[0]
    o_ref = args[-1]
    params = args[1:-1]

    h = x_ref[...].astype(jnp.float32)
    idx = 0
    for (d_valid, use_norm) in layer_meta:
        w = params[idx][...]
        b = params[idx + 1][...]
        idx += 2
        # Linear (MXU) + bias, f32 accumulation.
        y = jnp.dot(h, w, preferred_element_type=jnp.float32) + b
        # Exact (erf-based) GELU.  Padded lanes stay exactly 0 (zero W cols,
        # zero bias, GELU(0) == 0), which keeps the LN stats below correct.
        y = _gelu_exact(y)
        if use_norm:
            g = params[idx][...]
            beta = params[idx + 1][...]
            idx += 2
            # Single-pass LayerNorm statistics over the VALID features only:
            # padded lanes contribute exactly 0 to both sums.
            inv_d = 1.0 / float(d_valid)
            s = jnp.sum(y, axis=-1, keepdims=True)
            ss = jnp.sum(y * y, axis=-1, keepdims=True)
            mean = s * inv_d
            var = ss * inv_d - mean * mean
            y = (y - mean) * jax.lax.rsqrt(var + 1e-5)
            y = y * g + beta  # padded gamma/beta are 0 -> padded lanes stay 0
        # TODO(synk): nn.Dropout(0.2) is identity in eval mode; training-mode
        # stochastic dropout is intentionally not emulated here.
        h = y
    o_ref[...] = h.astype(o_ref.dtype)


def init_expr_decoder_params(key, n_latent, n_hidden, n_out):
    """Deterministic synthetic params with the same shapes as ExprDecoder.__init__."""
    dims = list(zip([n_latent] + n_hidden, n_hidden + [n_out]))
    params = []
    for i, (d_in, d_out) in enumerate(dims):
        key, kw, kb = jax.random.split(key, 3)
        bound = 1.0 / (d_in ** 0.5)  # nn.Linear default init range
        w = jax.random.uniform(kw, (d_in, d_out), jnp.float32, -bound, bound)
        b = jax.random.uniform(kb, (1, d_out), jnp.float32, -bound, bound)
        gamma = jnp.ones((1, d_out), jnp.float32)   # nn.LayerNorm default weight
        beta = jnp.zeros((1, d_out), jnp.float32)   # nn.LayerNorm default bias
        use_norm = i < len(dims) - 1  # ExprDecoder passes norm_last_layer=False
        params.append((w, b, gamma, beta, use_norm))
    return params


def expr_decoder_forward(x, params, tm_target=256):
    """ExprDecoder.forward, last_k == 1 branch, as one fused Pallas kernel."""
    # TODO(synk): last_k > 1 branch (multiple_outputs feature accumulation) not implemented.
    batch, n_labels, n_latent = x.shape
    n = batch * n_labels
    h = x.reshape(n, n_latent).astype(jnp.float32)

    # ---- Row tiling: big lane-/sublane-aligned tiles, >=2 parallel steps when
    # the problem is big enough (v7x has 2 TensorCores). ----
    n8 = _round_up(n, _SUBLANE)
    if n8 <= tm_target:
        tm = n8                                            # one tile covers all rows
    elif n8 <= 2 * tm_target:
        tm = _round_up(-(-n8 // 2), _SUBLANE)              # two ~equal parallel tiles
    else:
        tm = tm_target
    n_pad = _round_up(n8, tm)
    grid = (n_pad // tm,)

    # ---- Lane-pad activations & parameters to multiples of 128. ----
    d_in = n_latent
    d_in_pad = _round_up(d_in, _LANE)
    x_pad = jnp.zeros((n_pad, d_in_pad), jnp.float32).at[:n, :d_in].set(h)

    flat_inputs = [x_pad]
    in_specs = [pl.BlockSpec((tm, d_in_pad), lambda i: (i, 0))]
    layer_meta = []
    vmem_bytes = 2 * tm * d_in_pad * 4  # double-buffered activation tile
    cur_in_pad = d_in_pad
    d_out = d_in
    for (w, b, gamma, beta, use_norm) in params:
        di, do = w.shape
        do_pad = _round_up(do, _LANE)
        w_pad = jnp.zeros((cur_in_pad, do_pad), jnp.float32).at[:di, :do].set(w)
        b_pad = jnp.zeros((1, do_pad), jnp.float32).at[:, :do].set(b.reshape(1, do))
        flat_inputs += [w_pad, b_pad]
        in_specs += [
            pl.BlockSpec((cur_in_pad, do_pad), lambda i: (0, 0)),  # resident weight
            pl.BlockSpec((1, do_pad), lambda i: (0, 0)),           # resident bias
        ]
        vmem_bytes += 2 * (cur_in_pad * do_pad + do_pad) * 4
        if use_norm:
            g_pad = jnp.zeros((1, do_pad), jnp.float32).at[:, :do].set(gamma.reshape(1, do))
            be_pad = jnp.zeros((1, do_pad), jnp.float32).at[:, :do].set(beta.reshape(1, do))
            flat_inputs += [g_pad, be_pad]
            in_specs += [
                pl.BlockSpec((1, do_pad), lambda i: (0, 0)),
                pl.BlockSpec((1, do_pad), lambda i: (0, 0)),
            ]
            vmem_bytes += 2 * 2 * do_pad * 4
        layer_meta.append((do, use_norm))
        cur_in_pad = do_pad
        d_out = do
    d_out_pad = cur_in_pad
    vmem_bytes += 2 * tm * d_out_pad * 4  # double-buffered output tile

    # Conservative VMEM budget so the same tiling also fits v7x's 32 MiB
    # default scoped limit (64 MiB physical) with room for in-kernel f32
    # intermediates.  ExprDecoder-sized layers are tiny compared to this.
    if vmem_bytes > 24 * 1024 * 1024:
        # TODO(synk): add a d_out (and/or K) grid axis with an f32 accumulator
        # for very large layers instead of keeping full weights resident.
        raise NotImplementedError(
            f"resident VMEM footprint {vmem_bytes / 2**20:.1f} MiB too large; "
            "layer tiling not implemented")

    kernel = functools.partial(_mlp_kernel, layer_meta=tuple(layer_meta))
    out = pl.pallas_call(
        kernel,
        out_shape=jax.ShapeDtypeStruct((n_pad, d_out_pad), jnp.float32),
        grid_spec=pltpu.PrefetchScalarGridSpec(
            num_scalar_prefetch=0,
            grid=grid,
            in_specs=in_specs,
            out_specs=pl.BlockSpec((tm, d_out_pad), lambda i: (i, 0)),
        ),
        compiler_params=pltpu.CompilerParams(
            dimension_semantics=("parallel",)),
    )(*flat_inputs)

    return out[:n, :d_out].reshape(batch, n_labels, d_out)


def expr_decoder_reference(x, params):
    """Pure-JAX reference mirroring the PyTorch forward (eval mode)."""
    from jax.scipy.special import erf
    batch, n_labels, n_latent = x.shape
    h = x.reshape(batch * n_labels, n_latent)
    for (w, b, gamma, beta, use_norm) in params:
        y = h @ w + b
        y = 0.5 * y * (1.0 + erf(y / jnp.sqrt(2.0)))
        if use_norm:
            mean = jnp.mean(y, axis=-1, keepdims=True)
            var = jnp.mean((y - mean) ** 2, axis=-1, keepdims=True)
            y = (y - mean) / jnp.sqrt(var + 1e-5) * gamma + beta
        h = y
    return h.reshape(batch, n_labels, -1)


if __name__ == "__main__":
    # Small shapes consistent with ExprDecoder: x is (batch, n_labels, n_latent)
    batch, n_labels = 2, 8
    n_latent, n_hidden, n_out = 32, [64, 64], 48

    key = jax.random.PRNGKey(0)
    key, kx, kp = jax.random.split(key, 3)
    x = jax.random.normal(kx, (batch, n_labels, n_latent), jnp.float32)
    params = init_expr_decoder_params(kp, n_latent, n_hidden, n_out)

    out = expr_decoder_forward(x, params)
    out = jax.block_until_ready(out)
    assert out.shape == (batch, n_labels, n_out), out.shape

    ref = expr_decoder_reference(x, params)
    err = float(jnp.max(jnp.abs(out - ref)))
    assert jnp.allclose(out, ref, atol=1e-3, rtol=1e-3), err

    print("KERNEL_OK")
</pallas_src>

<mosaic_0001>
module attributes {stable_mosaic.version = 11 : i64} {
  func.func @_mlp_kernel(%arg0: i32, %arg1: memref<16x128xf32, #tpu.memory_space<vmem>>, %arg2: memref<128x128xf32, #tpu.memory_space<vmem>>, %arg3: memref<1x128xf32, #tpu.memory_space<vmem>>, %arg4: memref<1x128xf32, #tpu.memory_space<vmem>>, %arg5: memref<1x128xf32, #tpu.memory_space<vmem>>, %arg6: memref<128x128xf32, #tpu.memory_space<vmem>>, %arg7: memref<1x128xf32, #tpu.memory_space<vmem>>, %arg8: memref<1x128xf32, #tpu.memory_space<vmem>>, %arg9: memref<1x128xf32, #tpu.memory_space<vmem>>, %arg10: memref<128x128xf32, #tpu.memory_space<vmem>>, %arg11: memref<1x128xf32, #tpu.memory_space<vmem>>, %arg12: memref<16x128xf32, #tpu.memory_space<vmem>>) attributes {dimension_semantics = [#tpu.dimension_semantics<parallel>], iteration_bounds = array<i64: 1>, scalar_prefetch = 0 : i64, scratch_operands = 0 : i64, tpu.core_type = #tpu.core_type<tc>, window_params = [{transform_indices = @transform_0, window_bounds = array<i64: 16, 128>}, {pipeline_mode = #tpu.pipeline_mode<synchronous>, transform_indices = @transform_1, window_bounds = array<i64: 128, 128>}, {pipeline_mode = #tpu.pipeline_mode<synchronous>, transform_indices = @transform_2, window_bounds = array<i64: 1, 128>}, {pipeline_mode = #tpu.pipeline_mode<synchronous>, transform_indices = @transform_3, window_bounds = array<i64: 1, 128>}, {pipeline_mode = #tpu.pipeline_mode<synchronous>, transform_indices = @transform_4, window_bounds = array<i64: 1, 128>}, {pipeline_mode = #tpu.pipeline_mode<synchronous>, transform_indices = @transform_5, window_bounds = array<i64: 128, 128>}, {pipeline_mode = #tpu.pipeline_mode<synchronous>, transform_indices = @transform_6, window_bounds = array<i64: 1, 128>}, {pipeline_mode = #tpu.pipeline_mode<synchronous>, transform_indices = @transform_7, window_bounds = array<i64: 1, 128>}, {pipeline_mode = #tpu.pipeline_mode<synchronous>, transform_indices = @transform_8, window_bounds = array<i64: 1, 128>}, {pipeline_mode = #tpu.pipeline_mode<synchronous>, transform_indices = @transform_9, window_bounds = array<i64: 128, 128>}, {pipeline_mode = #tpu.pipeline_mode<synchronous>, transform_indices = @transform_10, window_bounds = array<i64: 1, 128>}, {transform_indices = @transform_11, window_bounds = array<i64: 16, 128>}]} {
    %c0 = arith.constant 0 : index
    %c0_0 = arith.constant 0 : index
    %0 = vector.load %arg1[%c0, %c0_0] : memref<16x128xf32, #tpu.memory_space<vmem>>, vector<16x128xf32>
    %c0_1 = arith.constant 0 : index
    %c0_2 = arith.constant 0 : index
    %1 = vector.load %arg2[%c0_1, %c0_2] : memref<128x128xf32, #tpu.memory_space<vmem>>, vector<128x128xf32>
    %c0_3 = arith.constant 0 : index
    %c0_4 = arith.constant 0 : index
    %2 = vector.load %arg3[%c0_3, %c0_4] : memref<1x128xf32, #tpu.memory_space<vmem>>, vector<1x128xf32>
    %cst = arith.constant dense<0.000000e+00> : vector<16x128xf32>
    %3 = tpu.matmul %0, %1, %cst {dimension_numbers = #tpu.dot_dimension_numbers<[1], [0], [0], [1], [0, 0, 1, 1], [], []>} : vector<16x128xf32>, vector<128x128xf32>, vector<16x128xf32> -> vector<16x128xf32>
    %4 = vector.broadcast %2 : vector<1x128xf32> to vector<16x128xf32>
    %5 = arith.addf %3, %4 : vector<16x128xf32>
    %cst_5 = arith.constant 5.000000e-01 : f32
    %6 = vector.broadcast %cst_5 : f32 to vector<16x128xf32>
    %7 = arith.mulf %6, %5 : vector<16x128xf32>
    %cst_6 = arith.constant 0.707106769 : f32
    %8 = vector.broadcast %cst_6 : f32 to vector<16x128xf32>
    %9 = arith.mulf %5, %8 : vector<16x128xf32>
    %cst_7 = arith.constant 0.000000e+00 : f32
    %10 = vector.broadcast %cst_7 : f32 to vector<16x128xf32>
    %11 = arith.cmpf olt, %9, %10 : vector<16x128xf32>
    %cst_8 = arith.constant -1.000000e+00 : f32
    %cst_9 = arith.constant 1.000000e+00 : f32
    %12 = vector.broadcast %cst_8 : f32 to vector<16x128xf32>
    %13 = vector.broadcast %cst_9 : f32 to vector<16x128xf32>
    %14 = arith.select %11, %12, %13 : vector<16x128xi1>, vector<16x128xf32>
    %15 = math.absf %9 : vector<16x128xf32>
    %cst_10 = arith.constant 0.327591091 : f32
    %16 = vector.broadcast %cst_10 : f32 to vector<16x128xf32>
    %17 = arith.mulf %16, %15 : vector<16x128xf32>
    %cst_11 = arith.constant 1.000000e+00 : f32
    %18 = vector.broadcast %cst_11 : f32 to vector<16x128xf32>
    %19 = arith.addf %18, %17 : vector<16x128xf32>
    %cst_12 = arith.constant 1.000000e+00 : f32
    %20 = vector.broadcast %cst_12 : f32 to vector<16x128xf32>
    %21 = arith.divf %20, %19 : vector<16x128xf32>
    %cst_13 = arith.constant 1.06140542 : f32
    %22 = vector.broadcast %cst_13 : f32 to vector<16x128xf32>
    %23 = arith.mulf %22, %21 : vector<16x128xf32>
    %cst_14 = arith.constant -1.45315206 : f32
    %24 = vector.broadcast %cst_14 : f32 to vector<16x128xf32>
    %25 = arith.addf %23, %24 : vector<16x128xf32>
    %26 = arith.mulf %25, %21 : vector<16x128xf32>
    %cst_15 = arith.constant 1.42141378 : f32
    %27 = vector.broadcast %cst_15 : f32 to vector<16x128xf32>
    %28 = arith.addf %26, %27 : vector<16x128xf32>
    %29 = arith.mulf %28, %21 : vector<16x128xf32>
    %cst_16 = arith.constant -0.284496725 : f32
    %30 = vector.broadcast %cst_16 : f32 to vector<16x128xf32>
    %31 = arith.addf %29, %30 : vector<16x128xf32>
    %32 = arith.mulf %31, %21 : vector<16x128xf32>
    %cst_17 = arith.constant 0.254829586 : f32
    %33 = vector.broadcast %cst_17 : f32 to vector<16x128xf32>
    %34 = arith.addf %32, %33 : vector<16x128xf32>
    %35 = arith.mulf %34, %21 : vector<16x128xf32>
    %cst_18 = arith.constant 0.000000e+00 : f32
    %36 = vector.broadcast %cst_18 : f32 to vector<16x128xf32>
    %37 = arith.subf %36, %15 : vector<16x128xf32>
    %38 = arith.mulf %37, %15 : vector<16x128xf32>
    %39 = math.exp %38 : vector<16x128xf32>
    %40 = arith.mulf %35, %39 : vector<16x128xf32>
    %cst_19 = arith.constant 1.000000e+00 : f32
    %41 = vector.broadcast %cst_19 : f32 to vector<16x128xf32>
    %42 = arith.subf %41, %40 : vector<16x128xf32>
    %43 = arith.mulf %14, %42 : vector<16x128xf32>
    %cst_20 = arith.constant 1.000000e+00 : f32
    %44 = vector.broadcast %cst_20 : f32 to vector<16x128xf32>
    %45 = arith.addf %44, %43 : vector<16x128xf32>
    %46 = arith.mulf %7, %45 : vector<16x128xf32>
    %c0_21 = arith.constant 0 : index
    %c0_22 = arith.constant 0 : index
    %47 = vector.load %arg4[%c0_21, %c0_22] : memref<1x128xf32, #tpu.memory_space<vmem>>, vector<1x128xf32>
    %c0_23 = arith.constant 0 : index
    %c0_24 = arith.constant 0 : index
    %48 = vector.load %arg5[%c0_23, %c0_24] : memref<1x128xf32, #tpu.memory_space<vmem>>, vector<1x128xf32>
    %cst_25 = arith.constant dense<0.000000e+00> : vector<16xf32>
    %49 = vector.multi_reduction <add>, %46, %cst_25 [1] : vector<16x128xf32> to vector<16xf32>
    %50 = vector.shape_cast %49 : vector<16xf32> to vector<16x1xf32>
    %51 = arith.mulf %46, %46 : vector<16x128xf32>
    %cst_26 = arith.constant dense<0.000000e+00> : vector<16xf32>
    %52 = vector.multi_reduction <add>, %51, %cst_26 [1] : vector<16x128xf32> to vector<16xf32>
    %53 = vector.shape_cast %52 : vector<16xf32> to vector<16x1xf32>
    %cst_27 = arith.constant 1.562500e-02 : f32
    %54 = vector.broadcast %cst_27 : f32 to vector<16x1xf32>
    %55 = arith.mulf %50, %54 : vector<16x1xf32>
    %cst_28 = arith.constant 1.562500e-02 : f32
    %56 = vector.broadcast %cst_28 : f32 to vector<16x1xf32>
    %57 = arith.mulf %53, %56 : vector<16x1xf32>
    %58 = arith.mulf %55, %55 : vector<16x1xf32>
    %59 = arith.subf %57, %58 : vector<16x1xf32>
    %60 = vector.broadcast %55 : vector<16x1xf32> to vector<16x128xf32>
    %61 = arith.subf %46, %60 : vector<16x128xf32>
    %cst_29 = arith.constant 9.99999974E-6 : f32
    %62 = vector.broadcast %cst_29 : f32 to vector<16x1xf32>
    %63 = arith.addf %59, %62 : vector<16x1xf32>
    %64 = math.rsqrt %63 : vector<16x1xf32>
    %65 = vector.broadcast %64 : vector<16x1xf32> to vector<16x128xf32>
    %66 = arith.mulf %61, %65 : vector<16x128xf32>
    %67 = vector.broadcast %47 : vector<1x128xf32> to vector<16x128xf32>
    %68 = arith.mulf %66, %67 : vector<16x128xf32>
    %69 = vector.broadcast %48 : vector<1x128xf32> to vector<16x128xf32>
    %70 = arith.addf %68, %69 : vector<16x128xf32>
    %c0_30 = arith.constant 0 : index
    %c0_31 = arith.constant 0 : index
    %71 = vector.load %arg6[%c0_30, %c0_31] : memref<128x128xf32, #tpu.memory_space<vmem>>, vector<128x128xf32>
    %c0_32 = arith.constant 0 : index
    %c0_33 = arith.constant 0 : index
    %72 = vector.load %arg7[%c0_32, %c0_33] : memref<1x128xf32, #tpu.memory_space<vmem>>, vector<1x128xf32>
    %cst_34 = arith.constant dense<0.000000e+00> : vector<16x128xf32>
    %73 = tpu.matmul %70, %71, %cst_34 {dimension_numbers = #tpu.dot_dimension_numbers<[1], [0], [0], [1], [0, 0, 1, 1], [], []>} : vector<16x128xf32>, vector<128x128xf32>, vector<16x128xf32> -> vector<16x128xf32>
    %74 = vector.broadcast %72 : vector<1x128xf32> to vector<16x128xf32>
    %75 = arith.addf %73, %74 : vector<16x128xf32>
    %cst_35 = arith.constant 5.000000e-01 : f32
    %76 = vector.broadcast %cst_35 : f32 to vector<16x128xf32>
    %77 = arith.mulf %76, %75 : vector<16x128xf32>
    %cst_36 = arith.constant 0.707106769 : f32
    %78 = vector.broadcast %cst_36 : f32 to vector<16x128xf32>
    %79 = arith.mulf %75, %78 : vector<16x128xf32>
    %cst_37 = arith.constant 0.000000e+00 : f32
    %80 = vector.broadcast %cst_37 : f32 to vector<16x128xf32>
    %81 = arith.cmpf olt, %79, %80 : vector<16x128xf32>
    %cst_38 = arith.constant -1.000000e+00 : f32
    %cst_39 = arith.constant 1.000000e+00 : f32
    %82 = vector.broadcast %cst_38 : f32 to vector<16x128xf32>
    %83 = vector.broadcast %cst_39 : f32 to vector<16x128xf32>
    %84 = arith.select %81, %82, %83 : vector<16x128xi1>, vector<16x128xf32>
    %85 = math.absf %79 : vector<16x128xf32>
    %cst_40 = arith.constant 0.327591091 : f32
    %86 = vector.broadcast %cst_40 : f32 to vector<16x128xf32>
    %87 = arith.mulf %86, %85 : vector<16x128xf32>
    %cst_41 = arith.constant 1.000000e+00 : f32
    %88 = vector.broadcast %cst_41 : f32 to vector<16x128xf32>
    %89 = arith.addf %88, %87 : vector<16x128xf32>
    %cst_42 = arith.constant 1.000000e+00 : f32
    %90 = vector.broadcast %cst_42 : f32 to vector<16x128xf32>
    %91 = arith.divf %90, %89 : vector<16x128xf32>
    %cst_43 = arith.constant 1.06140542 : f32
    %92 = vector.broadcast %cst_43 : f32 to vector<16x128xf32>
    %93 = arith.mulf %92, %91 : vector<16x128xf32>
    %cst_44 = arith.constant -1.45315206 : f32
    %94 = vector.broadcast %cst_44 : f32 to vector<16x128xf32>
    %95 = arith.addf %93, %94 : vector<16x128xf32>
    %96 = arith.mulf %95, %91 : vector<16x128xf32>
    %cst_45 = arith.constant 1.42141378 : f32
    %97 = vector.broadcast %cst_45 : f32 to vector<16x128xf32>
    %98 = arith.addf %96, %97 : vector<16x128xf32>
    %99 = arith.mulf %98, %91 : vector<16x128xf32>
    %cst_46 = arith.constant -0.284496725 : f32
    %100 = vector.broadcast %cst_46 : f32 to vector<16x128xf32>
    %101 = arith.addf %99, %100 : vector<16x128xf32>
    %102 = arith.mulf %101, %91 : vector<16x128xf32>
    %cst_47 = arith.constant 0.254829586 : f32
    %103 = vector.broadcast %cst_47 : f32 to vector<16x128xf32>
    %104 = arith.addf %102, %103 : vector<16x128xf32>
    %105 = arith.mulf %104, %91 : vector<16x128xf32>
    %cst_48 = arith.constant 0.000000e+00 : f32
    %106 = vector.broadcast %cst_48 : f32 to vector<16x128xf32>
    %107 = arith.subf %106, %85 : vector<16x128xf32>
    %108 = arith.mulf %107, %85 : vector<16x128xf32>
    %109 = math.exp %108 : vector<16x128xf32>
    %110 = arith.mulf %105, %109 : vector<16x128xf32>
    %cst_49 = arith.constant 1.000000e+00 : f32
    %111 = vector.broadcast %cst_49 : f32 to vector<16x128xf32>
    %112 = arith.subf %111, %110 : vector<16x128xf32>
    %113 = arith.mulf %84, %112 : vector<16x128xf32>
    %cst_50 = arith.constant 1.000000e+00 : f32
    %114 = vector.broadcast %cst_50 : f32 to vector<16x128xf32>
    %115 = arith.addf %114, %113 : vector<16x128xf32>
    %116 = arith.mulf %77, %115 : vector<16x128xf32>
    %c0_51 = arith.constant 0 : index
    %c0_52 = arith.constant 0 : index
    %117 = vector.load %arg8[%c0_51, %c0_52] : memref<1x128xf32, #tpu.memory_space<vmem>>, vector<1x128xf32>
    %c0_53 = arith.constant 0 : index
    %c0_54 = arith.constant 0 : index
    %118 = vector.load %arg9[%c0_53, %c0_54] : memref<1x128xf32, #tpu.memory_space<vmem>>, vector<1x128xf32>
    %cst_55 = arith.constant dense<0.000000e+00> : vector<16xf32>
    %119 = vector.multi_reduction <add>, %116, %cst_55 [1] : vector<16x128xf32> to vector<16xf32>
    %120 = vector.shape_cast %119 : vector<16xf32> to vector<16x1xf32>
    %121 = arith.mulf %116, %116 : vector<16x128xf32>
    %cst_56 = arith.constant dense<0.000000e+00> : vector<16xf32>
    %122 = vector.multi_reduction <add>, %121, %cst_56 [1] : vector<16x128xf32> to vector<16xf32>
    %123 = vector.shape_cast %122 : vector<16xf32> to vector<16x1xf32>
    %cst_57 = arith.constant 1.562500e-02 : f32
    %124 = vector.broadcast %cst_57 : f32 to vector<16x1xf32>
    %125 = arith.mulf %120, %124 : vector<16x1xf32>
    %cst_58 = arith.constant 1.562500e-02 : f32
    %126 = vector.broadcast %cst_58 : f32 to vector<16x1xf32>
    %127 = arith.mulf %123, %126 : vector<16x1xf32>
    %128 = arith.mulf %125, %125 : vector<16x1xf32>
    %129 = arith.subf %127, %128 : vector<16x1xf32>
    %130 = vector.broadcast %125 : vector<16x1xf32> to vector<16x128xf32>
    %131 = arith.subf %116, %130 : vector<16x128xf32>
    %cst_59 = arith.constant 9.99999974E-6 : f32
    %132 = vector.broadcast %cst_59 : f32 to vector<16x1xf32>
    %133 = arith.addf %129, %132 : vector<16x1xf32>
    %134 = math.rsqrt %133 : vector<16x1xf32>
    %135 = vector.broadcast %134 : vector<16x1xf32> to vector<16x128xf32>
    %136 = arith.mulf %131, %135 : vector<16x128xf32>
    %137 = vector.broadcast %117 : vector<1x128xf32> to vector<16x128xf32>
    %138 = arith.mulf %136, %137 : vector<16x128xf32>
    %139 = vector.broadcast %118 : vector<1x128xf32> to vector<16x128xf32>
    %140 = arith.addf %138, %139 : vector<16x128xf32>
    %c0_60 = arith.constant 0 : index
    %c0_61 = arith.constant 0 : index
    %141 = vector.load %arg10[%c0_60, %c0_61] : memref<128x128xf32, #tpu.memory_space<vmem>>, vector<128x128xf32>
    %c0_62 = arith.constant 0 : index
    %c0_63 = arith.constant 0 : index
    %142 = vector.load %arg11[%c0_62, %c0_63] : memref<1x128xf32, #tpu.memory_space<vmem>>, vector<1x128xf32>
    %cst_64 = arith.constant dense<0.000000e+00> : vector<16x128xf32>
    %143 = tpu.matmul %140, %141, %cst_64 {dimension_numbers = #tpu.dot_dimension_numbers<[1], [0], [0], [1], [0, 0, 1, 1], [], []>} : vector<16x128xf32>, vector<128x128xf32>, vector<16x128xf32> -> vector<16x128xf32>
    %144 = vector.broadcast %142 : vector<1x128xf32> to vector<16x128xf32>
    %145 = arith.addf %143, %144 : vector<16x128xf32>
    %cst_65 = arith.constant 5.000000e-01 : f32
    %146 = vector.broadcast %cst_65 : f32 to vector<16x128xf32>
    %147 = arith.mulf %146, %145 : vector<16x128xf32>
    %cst_66 = arith.constant 0.707106769 : f32
    %148 = vector.broadcast %cst_66 : f32 to vector<16x128xf32>
    %149 = arith.mulf %145, %148 : vector<16x128xf32>
    %cst_67 = arith.constant 0.000000e+00 : f32
    %150 = vector.broadcast %cst_67 : f32 to vector<16x128xf32>
    %151 = arith.cmpf olt, %149, %150 : vector<16x128xf32>
    %cst_68 = arith.constant -1.000000e+00 : f32
    %cst_69 = arith.constant 1.000000e+00 : f32
    %152 = vector.broadcast %cst_68 : f32 to vector<16x128xf32>
    %153 = vector.broadcast %cst_69 : f32 to vector<16x128xf32>
    %154 = arith.select %151, %152, %153 : vector<16x128xi1>, vector<16x128xf32>
    %155 = math.absf %149 : vector<16x128xf32>
    %cst_70 = arith.constant 0.327591091 : f32
    %156 = vector.broadcast %cst_70 : f32 to vector<16x128xf32>
    %157 = arith.mulf %156, %155 : vector<16x128xf32>
    %cst_71 = arith.constant 1.000000e+00 : f32
    %158 = vector.broadcast %cst_71 : f32 to vector<16x128xf32>
    %159 = arith.addf %158, %157 : vector<16x128xf32>
    %cst_72 = arith.constant 1.000000e+00 : f32
    %160 = vector.broadcast %cst_72 : f32 to vector<16x128xf32>
    %161 = arith.divf %160, %159 : vector<16x128xf32>
    %cst_73 = arith.constant 1.06140542 : f32
    %162 = vector.broadcast %cst_73 : f32 to vector<16x128xf32>
    %163 = arith.mulf %162, %161 : vector<16x128xf32>
    %cst_74 = arith.constant -1.45315206 : f32
    %164 = vector.broadcast %cst_74 : f32 to vector<16x128xf32>
    %165 = arith.addf %163, %164 : vector<16x128xf32>
    %166 = arith.mulf %165, %161 : vector<16x128xf32>
    %cst_75 = arith.constant 1.42141378 : f32
    %167 = vector.broadcast %cst_75 : f32 to vector<16x128xf32>
    %168 = arith.addf %166, %167 : vector<16x128xf32>
    %169 = arith.mulf %168, %161 : vector<16x128xf32>
    %cst_76 = arith.constant -0.284496725 : f32
    %170 = vector.broadcast %cst_76 : f32 to vector<16x128xf32>
    %171 = arith.addf %169, %170 : vector<16x128xf32>
    %172 = arith.mulf %171, %161 : vector<16x128xf32>
    %cst_77 = arith.constant 0.254829586 : f32
    %173 = vector.broadcast %cst_77 : f32 to vector<16x128xf32>
    %174 = arith.addf %172, %173 : vector<16x128xf32>
    %175 = arith.mulf %174, %161 : vector<16x128xf32>
    %cst_78 = arith.constant 0.000000e+00 : f32
    %176 = vector.broadcast %cst_78 : f32 to vector<16x128xf32>
    %177 = arith.subf %176, %155 : vector<16x128xf32>
    %178 = arith.mulf %177, %155 : vector<16x128xf32>
    %179 = math.exp %178 : vector<16x128xf32>
    %180 = arith.mulf %175, %179 : vector<16x128xf32>
    %cst_79 = arith.constant 1.000000e+00 : f32
    %181 = vector.broadcast %cst_79 : f32 to vector<16x128xf32>
    %182 = arith.subf %181, %180 : vector<16x128xf32>
    %183 = arith.mulf %154, %182 : vector<16x128xf32>
    %cst_80 = arith.constant 1.000000e+00 : f32
    %184 = vector.broadcast %cst_80 : f32 to vector<16x128xf32>
    %185 = arith.addf %184, %183 : vector<16x128xf32>
    %186 = arith.mulf %147, %185 : vector<16x128xf32>
    %c0_81 = arith.constant 0 : index
    %c0_82 = arith.constant 0 : index
    %187 = vector.load %arg12[%c0_81, %c0_82] : memref<16x128xf32, #tpu.memory_space<vmem>>, vector<16x128xf32>
    tpu.vector_store %arg12[%c0_81, %c0_82], %186 {strides = array<i32>} : memref<16x128xf32, #tpu.memory_space<vmem>>, vector<16x128xf32>,
    return
  }
  func.func @transform_0(%arg0: i32) -> (i32, i32) {
    %c0_i32 = arith.constant 0 : i32
    %c0_i32_0 = arith.constant 0 : i32
    return %arg0, %c0_i32 : i32, i32
  }
  func.func @transform_1(%arg0: i32) -> (i32, i32) {
    %c0_i32 = arith.constant 0 : i32
    %c0_i32_0 = arith.constant 0 : i32
    %c0_i32_1 = arith.constant 0 : i32
    return %c0_i32, %c0_i32_0 : i32, i32
  }
  func.func @transform_2(%arg0: i32) -> (i32, i32) {
    %c0_i32 = arith.constant 0 : i32
    %c0_i32_0 = arith.constant 0 : i32
    %c0_i32_1 = arith.constant 0 : i32
    return %c0_i32, %c0_i32_0 : i32, i32
  }
  func.func @transform_3(%arg0: i32) -> (i32, i32) {
    %c0_i32 = arith.constant 0 : i32
    %c0_i32_0 = arith.constant 0 : i32
    %c0_i32_1 = arith.constant 0 : i32
    return %c0_i32, %c0_i32_0 : i32, i32
  }
  func.func @transform_4(%arg0: i32) -> (i32, i32) {
    %c0_i32 = arith.constant 0 : i32
    %c0_i32_0 = arith.constant 0 : i32
    %c0_i32_1 = arith.constant 0 : i32
    return %c0_i32, %c0_i32_0 : i32, i32
  }
  func.func @transform_5(%arg0: i32) -> (i32, i32) {
    %c0_i32 = arith.constant 0 : i32
    %c0_i32_0 = arith.constant 0 : i32
    %c0_i32_1 = arith.constant 0 : i32
    return %c0_i32, %c0_i32_0 : i32, i32
  }
  func.func @transform_6(%arg0: i32) -> (i32, i32) {
    %c0_i32 = arith.constant 0 : i32
    %c0_i32_0 = arith.constant 0 : i32
    %c0_i32_1 = arith.constant 0 : i32
    return %c0_i32, %c0_i32_0 : i32, i32
  }
  func.func @transform_7(%arg0: i32) -> (i32, i32) {
    %c0_i32 = arith.constant 0 : i32
    %c0_i32_0 = arith.constant 0 : i32
    %c0_i32_1 = arith.constant 0 : i32
    return %c0_i32, %c0_i32_0 : i32, i32
  }
  func.func @transform_8(%arg0: i32) -> (i32, i32) {
    %c0_i32 = arith.constant 0 : i32
    %c0_i32_0 = arith.constant 0 : i32
    %c0_i32_1 = arith.constant 0 : i32
    return %c0_i32, %c0_i32_0 : i32, i32
  }
  func.func @transform_9(%arg0: i32) -> (i32, i32) {
    %c0_i32 = arith.constant 0 : i32
    %c0_i32_0 = arith.constant 0 : i32
    %c0_i32_1 = arith.constant 0 : i32
    return %c0_i32, %c0_i32_0 : i32, i32
  }
  func.func @transform_10(%arg0: i32) -> (i32, i32) {
    %c0_i32 = arith.constant 0 : i32
    %c0_i32_0 = arith.constant 0 : i32
    %c0_i32_1 = arith.constant 0 : i32
    return %c0_i32, %c0_i32_0 : i32, i32
  }
  func.func @transform_11(%arg0: i32) -> (i32, i32) {
    %c0_i32 = arith.constant 0 : i32
    %c0_i32_0 = arith.constant 0 : i32
    return %arg0, %c0_i32 : i32, i32
  }
}

</mosaic_0001>

<bundles_post_ra>
// kernel: tpu_custom_call.1
= control target key start
LH: loop header
LB: loop body
LE: loop exit
PB: predicated region body
PF: predicated region fallthrough
CT: control target
= control target key end

     0   :  { %16 = vsyncpa [#allocation3], 0  ;;  %s1289_s0 = inlined_call_operand.hbm [shape: f32[16,128], index: 0, kind: input, shape index: {}]   ;;  %s1290_s1 = inlined_call_operand.hbm [shape: f32[128,128], index: 1, kind: input, shape index: {}]   ;;  %s1291_s2 = inlined_call_operand.vmem [shape: f32[1,128], index: 2, kind: input, shape index: {}]   ;;  %s1292_s3 = inlined_call_operand.vmem [shape: f32[1,128], index: 3, kind: input, shape index: {}]   ;;  %s1293_s4 = inlined_call_operand.vmem [shape: f32[1,128], index: 4, kind: input, shape index: {}]   ;;  %s1294_s5 = inlined_call_operand.hbm [shape: f32[128,128], index: 5, kind: input, shape index: {}]   ;;  %s1295_s6 = inlined_call_operand.vmem [shape: f32[1,128], index: 6, kind: input, shape index: {}]   ;;  %s1296_s7 = inlined_call_operand.vmem [shape: f32[1,128], index: 7, kind: input, shape index: {}]   ;;  %s1297_s8 = inlined_call_operand.vmem [shape: f32[1,128], index: 8, kind: input, shape index: {}]   ;;  %s1298_s9 = inlined_call_operand.hbm [shape: f32[128,128], index: 9, kind: input, shape index: {}]   ;;  %s1299_s10 = inlined_call_operand.vmem [shape: f32[1,128], index: 10, kind: input, shape index: {}]   ;;  %s1300_s11 = inlined_call_operand.hbm [shape: f32[16,128], index: 11, kind: output, shape index: {}]  }
   0x1   :  { %17 = vsyncpa [#allocation6], 0 }
   0x2   :  { %18 = vsyncpa [#allocation9], 0 }
   0x3   :  { %19 = vsyncpa [#allocation4], 0  ;;  %s1081_s17 = smov [#allocation5]   ;;  %s1082_s19 = smov [#allocation2]  }
   0x4   :  { %s37_s18 = sshll.u32 %s1081_s17, 4  ;;  %s25_s20 = sshll.u32 %s1082_s19, 4  ;;  %s38_s18 = int_to_ptr.vmem [resolvable:$true] %s37_s18  ;;  %s1149_s20 = int_to_ptr.vmem [resolvable:$true] %s25_s20 }
   0x5   :  { %s963_s23 = scalar_lea.hbm %s1290_s1, 2048 }
   0x6   :  { %p964_p0 = scmp.ne.s32.totalorder %s1290_s1, %s963_s23  ;;  %p967_p1 = scmp.lt.u32.totalorder %s963_s23, %s1290_s1 }
   0x8   :  { %p969_p2 = pnand %p967_p1, %p964_p0 }
   0xa   :  { %972 = shalt.err (!%p969_p2)
}
   0xb   :  { %s973_s28 = scalar_lea.vmem %s38_s18, 2048  ;;  %p978_p4 = scmp.lt.s32.totalorder %s38_s18, %s38_s18 }
   0xc   :  { %p974_p3 = scmp.ne.s32.totalorder %s38_s18, %s973_s28  ;;  %p979_p5 = scmp.lt.s32.totalorder %s973_s28, %s973_s28 }
   0xe   :  { %p980_p6 = por %p979_p5, %p978_p4 }
  0x10   :  { %p981_p7 = pnand %p980_p6, %p974_p3 }
  0x12   :  { %984 = shalt.err (!%p981_p7)
}
  0x13   :  { %s1083_s29 = smov 128   ;;  %s1084_s30 = smov 8  }
  0x14   :  { %43 = dma.hbm_to_vmem [thread:$0]  %s1290_s1, 2048, %s38_s18, [#allocation6], %s1083_s29, %s1083_s29, %s1084_s30  }
  0x15   :  { %s985_s16 = scalar_lea.hbm %s1289_s0, 256 }
  0x16   :  { %p986_p8 = scmp.ne.s32.totalorder %s1289_s0, %s985_s16  ;;  %p989_p9 = scmp.lt.u32.totalorder %s985_s16, %s1289_s0 }
  0x18   :  { %p991_p10 = pnand %p989_p9, %p986_p8 }
  0x1a   :  { %994 = shalt.err (!%p991_p10)
}
  0x1b   :  { %s995_s23 = scalar_lea.vmem %s1149_s20, 256  ;;  %p1000_p12 = scmp.lt.s32.totalorder %s1149_s20, %s1149_s20 }
  0x1c   :  { %p996_p11 = scmp.ne.s32.totalorder %s1149_s20, %s995_s23  ;;  %p1001_p13 = scmp.lt.s32.totalorder %s995_s23, %s995_s23 }
  0x1e   :  { %p1002_p0 = por %p1001_p13, %p1000_p12 }
  0x20   :  { %p1003_p1 = pnand %p1002_p0, %p996_p11 }
  0x22   :  { %1006 = shalt.err (!%p1003_p1)
}
  0x23   :  { %31 = dma.hbm_to_vmem [thread:$0]  %s1289_s0, 256, %s1149_s20, [#allocation3], %s1083_s29, %s1083_s29, %s1084_s30  }
  0x24   :  { %s1085_s24 = smov [#allocation7]   ;;  %s1086_s26 = smov [#allocation8]  }
  0x25   :  { %s55_s25 = sshll.u32 %s1085_s24, 4  ;;  %s73_s27 = sshll.u32 %s1086_s26, 4  ;;  %s56_s25 = int_to_ptr.vmem [resolvable:$true] %s55_s25  ;;  %s1186_s27 = int_to_ptr.vmem [resolvable:$true] %s73_s27 }
  0x26   :  { %s1007_s13 = scalar_lea.hbm %s1294_s5, 2048 }
  0x27   :  { %p1008_p2 = scmp.ne.s32.totalorder %s1294_s5, %s1007_s13  ;;  %p1011_p3 = scmp.lt.u32.totalorder %s1007_s13, %s1294_s5 }
  0x29   :  { %p1013_p4 = pnand %p1011_p3, %p1008_p2 }
  0x2b   :  { %1016 = shalt.err (!%p1013_p4)
}
  0x2c   :  { %s1017_s0 = scalar_lea.vmem %s56_s25, 2048  ;;  %p1022_p6 = scmp.lt.s32.totalorder %s56_s25, %s56_s25 }
  0x2d   :  { %p1018_p5 = scmp.ne.s32.totalorder %s56_s25, %s1017_s0  ;;  %p1023_p7 = scmp.lt.s32.totalorder %s1017_s0, %s1017_s0 }
  0x2f   :  { %p1024_p8 = por %p1023_p7, %p1022_p6 }
  0x31   :  { %p1025_p9 = pnand %p1024_p8, %p1018_p5 }
  0x33   :  { %1028 = shalt.err (!%p1025_p9)
}
  0x34   :  { %61 = dma.hbm_to_vmem [thread:$0]  %s1294_s5, 2048, %s56_s25, [#allocation6], %s1083_s29, %s1083_s29, %s1084_s30  }
  0x35   :  { %s1029_s23 = scalar_lea.hbm %s1298_s9, 2048 }
  0x36   :  { %p1030_p10 = scmp.ne.s32.totalorder %s1298_s9, %s1029_s23  ;;  %p1033_p11 = scmp.lt.u32.totalorder %s1029_s23, %s1298_s9 }
  0x38   :  { %p1035_p12 = pnand %p1033_p11, %p1030_p10 }
  0x3a   :  { %1038 = shalt.err (!%p1035_p12)
}
  0x3b   :  { %s1039_s28 = scalar_lea.vmem %s1186_s27, 2048  ;;  %p1044_p0 = scmp.lt.s32.totalorder %s1186_s27, %s1186_s27 }
  0x3c   :  { %p1040_p13 = scmp.ne.s32.totalorder %s1186_s27, %s1039_s28  ;;  %p1045_p1 = scmp.lt.s32.totalorder %s1039_s28, %s1039_s28 }
  0x3e   :  { %p1046_p2 = por %p1045_p1, %p1044_p0 }
  0x40   :  { %p1047_p3 = pnand %p1046_p2, %p1040_p13 }
  0x42   :  { %1050 = shalt.err (!%p1047_p3)
}
  0x43   :  { %79 = dma.hbm_to_vmem [thread:$0]  %s1298_s9, 2048, %s1186_s27, [#allocation9], %s1083_s29, %s1083_s29, %s1084_s30  }
  0x44   :  { %1073 = dma.done.wait [#allocation3], 256  }
  0x45   :  { %1074 = vsyncadd [#allocation3], 4294967040 }
  0x46   :  { %1075 = dma.done.wait [#allocation6], 4096  }
  0x47   :  { %1076 = vsyncadd [#allocation6], 4294963200 }
  0x48   :  { %1077 = dma.done.wait [#allocation9], 2048  }
  0x49   :  { %1078 = vsyncadd [#allocation9], 4294965248  ;;  %v96_v0 = vld [vmem:[#allocation5] sm:$0xff]  ;;  %v97_v1 = vld [vmem:[#allocation5 + $0x8] sm:$0xff] }
  0x4a   :  { %v98_v2 = vld [vmem:[#allocation5 + $0x10] sm:$0xff]  ;;  %v827_v3 = vpack.c.bf16 %v97_v1, %v96_v0  ;;  %v99_v4 = vld [vmem:[#allocation5 + $0x18] sm:$0xff]  ;;  %v100_v6 = vld [vmem:[#allocation5 + $0x20] sm:$0xff] }
  0x4b   :  { %v831_v5 = vpack.c.bf16 %v99_v4, %v98_v2  ;;  %v101_v7 = vld [vmem:[#allocation5 + $0x28] sm:$0xff]  ;;  %v94_v9 = vld [vmem:[#allocation2] sm:$0xff]  ;;  %v103_v11 = vld [vmem:[#allocation5 + $0x38] sm:$0xff] }
  0x4c   :  { %828 = vmatprep.subr.bf16.mxu0 %v827_v3  ;;  %v835_v8 = vpack.c.bf16 %v101_v7, %v100_v6  ;;  %v102_v10 = vld [vmem:[#allocation5 + $0x30] sm:$0xff]  ;;  %754 = vmatprep.mubr.f32.mxu0 %v94_v9  ;;  %v104_v13 = vld [vmem:[#allocation5 + $0x40] sm:$0xff]  ;;  %v105_v14 = vld [vmem:[#allocation5 + $0x48] sm:$0xff]  ;;  %v1087_v9 = vmov 1.0  }
  0x4d   :  { %830 = vmatpush3.bf16.msra.mxu0 %v827_v3  ;;  %v839_v12 = vpack.c.bf16 %v103_v11, %v102_v10  ;;  %v843_v15 = vpack.c.bf16 %v105_v14, %v104_v13  ;;  %v106_v16 = vld [vmem:[#allocation5 + $0x50] sm:$0xff]  ;;  %v107_v17 = vld [vmem:[#allocation5 + $0x58] sm:$0xff]  ;;  %v108_v19 = vld [vmem:[#allocation5 + $0x60] sm:$0xff] }
  0x4e   :  { %832 = vmatprep.subr.bf16.mxu0 %v831_v5  ;;  %v847_v18 = vpack.c.bf16 %v107_v17, %v106_v16  ;;  %v109_v20 = vld [vmem:[#allocation5 + $0x68] sm:$0xff]  ;;  %v110_v22 = vld [vmem:[#allocation5 + $0x70] sm:$0xff]  ;;  %v111_v23 = vld [vmem:[#allocation5 + $0x78] sm:$0xff] }
  0x4f   :  { %v851_v21 = vpack.c.bf16 %v109_v20, %v108_v19  ;;  %v855_v24 = vpack.c.bf16 %v111_v23, %v110_v22  ;;  %v95_v25 = vld [vmem:[#allocation2 + $0x8] sm:$0xff]  ;;  %v292_v26 = vld [vmem:[#allocation7] sm:$0xff]  ;;  %v293_v27 = vld [vmem:[#allocation7 + $0x8] sm:$0xff] }
  0x50   :  { %v859_v28 = vpack.c.bf16 %v293_v27, %v292_v26  ;;  %v661_v29 = vld [vmem:[%s1291_s2] ss:$0 sm:$0xff]  ;;  %v296_v26 = vld [vmem:[#allocation7 + $0x20] sm:$0xff]  ;;  %v297_v27 = vld [vmem:[#allocation7 + $0x28] sm:$0xff] }
  0x51   :  { %834 = vmatpush3.bf16.msra.mxu0 %v831_v5  ;;  %v294_v23 = vld [vmem:[#allocation7 + $0x10] sm:$0xff] }
  0x52   :  { %836 = vmatprep.subr.bf16.mxu0 %v835_v8  ;;  %860 = vmatprep.subr.bf16.mxu1 %v859_v28 }
  0x53   :  { %862 = vmatpush3.bf16.msra.mxu1 %v859_v28  ;;  %v867_v28 = vpack.c.bf16 %v297_v27, %v296_v26 }
  0x55   :  { %838 = vmatpush3.bf16.msra.mxu0 %v835_v8 }
  0x56   :  { %840 = vmatprep.subr.bf16.mxu0 %v839_v12 }
  0x59   :  { %842 = vmatpush3.bf16.msra.mxu0 %v839_v12 }
  0x5a   :  { %844 = vmatprep.subr.bf16.mxu0 %v843_v15 }
  0x5d   :  { %846 = vmatpush3.bf16.msra.mxu0 %v843_v15 }
  0x5e   :  { %848 = vmatprep.subr.bf16.mxu0 %v847_v18 }
  0x61   :  { %850 = vmatpush3.bf16.msra.mxu0 %v847_v18 }
  0x62   :  { %852 = vmatprep.subr.bf16.mxu0 %v851_v21 }
  0x65   :  { %854 = vmatpush3.bf16.msra.mxu0 %v851_v21 }
  0x66   :  { %856 = vmatprep.subr.bf16.mxu0 %v855_v24 }
  0x69   :  { %858 = vmatpush3.bf16.msra.mxu0 %v855_v24  ;;  %v295_v24 = vld [vmem:[#allocation7 + $0x18] sm:$0xff] }
  0x6c   :  { %755 = vmatmul.mubr.f32.vlgmr.msra.gmra.mrb[0].mxu0 %v95_v25  ;;  %v863_v25 = vpack.c.bf16 %v295_v24, %v294_v23 }
  0x6e   :  { %864 = vmatprep.subr.bf16.mxu1 %v863_v25 }
  0x6f   :  { %866 = vmatpush3.bf16.msra.mxu1 %v863_v25 }
  0x70   :  { %868 = vmatprep.subr.bf16.mxu1 %v867_v28 }
  0x73   :  { %870 = vmatpush3.bf16.msra.mxu1 %v867_v28 }
 0x13f   :  { %v756_v30 = vpop.f32.mrb[0].mxu0 }
 0x140   :  { %v191_v31 = vadd.f32 %v756_v30, %v661_v29  ;;  %v185_v32 = vpop.f32.mrb[1].mxu0  ;;  %v299_v30 = vld [vmem:[#allocation7 + $0x38] sm:$0xff] }
 0x141   :  { %v186_v33 = vadd.f32 %v661_v29, %v185_v32  ;;  %v298_v29 = vld [vmem:[#allocation7 + $0x30] sm:$0xff]  ;;  %v300_v32 = vld [vmem:[#allocation7 + $0x40] sm:$0xff] }
 0x142   :  { %v197_v34 = vmul.f32 0.70710677, %v191_v31  ;;  %v195_v18 = vmul.f32 0.5, %v191_v31  ;;  %v871_v31 = vpack.c.bf16 %v299_v30, %v298_v29 }
 0x143   :  { %v196_v35 = vmul.f32 0.70710677, %v186_v33  ;;  %v194_v15 = vmul.f32 0.5, %v186_v33  ;;  %v301_v33 = vld [vmem:[#allocation7 + $0x48] sm:$0xff] }
 0x144   :  { %v203_v36 = vand.u32 2147483647, %v197_v34  ;;  %vm199_vm0 = vcmp.lt.f32.partialorder %v197_v34, 0.0  ;;  %872 = vmatprep.subr.bf16.mxu1 %v871_v31  ;;  %v875_v34 = vpack.c.bf16 %v301_v33, %v300_v32 }
 0x145   :  { %v202_v37 = vand.u32 2147483647, %v196_v35  ;;  %vm198_vm1 = vcmp.lt.f32.partialorder %v196_v35, 0.0  ;;  %v201_v10 = vsel %vm199_vm0, -1.0, %v1087_v9  ;;  %874 = vmatpush3.bf16.msra.mxu1 %v871_v31  ;;  %v302_v35 = vld [vmem:[#allocation7 + $0x50] sm:$0xff] }
 0x146   :  { %v205_v38 = vmul.f32 0.3275911, %v203_v36  ;;  %v231_v42 = vsub.f32 0.0, %v203_v36  ;;  %v200_v12 = vsel %vm198_vm1, -1.0, %v1087_v9  ;;  %876 = vmatprep.subr.bf16.mxu1 %v875_v34 }
 0x147   :  { %v204_v39 = vmul.f32 0.3275911, %v202_v37  ;;  %v230_v43 = vsub.f32 0.0, %v202_v37 }
 0x148   :  { %v207_v40 = vadd.f32 1.0, %v205_v38  ;;  %v233_v45 = vmul.f32 %v231_v42, %v203_v36  ;;  %v303_v36 = vld [vmem:[#allocation7 + $0x58] sm:$0xff] }
 0x149   :  { %v206_v41 = vadd.f32 1.0, %v204_v39  ;;  %v232_v47 = vmul.f32 %v230_v43, %v202_v37  ;;  %v304_v37 = vld [vmem:[#allocation7 + $0x60] sm:$0xff]  ;;  %v879_v38 = vpack.c.bf16 %v303_v36, %v302_v35  ;;  %v305_v39 = vld [vmem:[#allocation7 + $0x68] sm:$0xff]  ;;  %878 = vmatpush3.bf16.msra.mxu1 %v875_v34  ;;  %v307_v42 = vld [vmem:[#allocation7 + $0x78] sm:$0xff] }
 0x14a   :  { %931 = vrcp.f32 %v207_v40  ;;  %v236_v51 = vmul.f32 1.442695, %v233_v45  ;;  %v883_v40 = vpack.c.bf16 %v305_v39, %v304_v37 }
 0x14b   :  { %933 = vrcp.f32 %v206_v41  ;;  %v234_v53 = vmul.f32 1.442695, %v232_v47  ;;  %880 = vmatprep.subr.bf16.mxu1 %v879_v38  ;;  %v306_v41 = vld [vmem:[#allocation7 + $0x70] sm:$0xff] }
 0x14c   :  { %935 = vpow2.f32 %v236_v51  ;;  %v887_v43 = vpack.c.bf16 %v307_v42, %v306_v41 }
 0x14d   :  { %937 = vpow2.f32 %v234_v53  ;;  %882 = vmatpush3.bf16.msra.mxu1 %v879_v38 }
 0x14e   :  { %884 = vmatprep.subr.bf16.mxu1 %v883_v40 }
 0x151   :  { %886 = vmatpush3.bf16.msra.mxu1 %v883_v40 }
 0x152   :  { %888 = vmatprep.subr.bf16.mxu1 %v887_v43 }
 0x154   :  { %v932_v44 = vpop.eup %931 }
 0x155   :  { %v934_v46 = vpop.eup %933  ;;  %v213_v48 = vmul.f32 1.0614054, %v932_v44  ;;  %890 = vmatpush3.bf16.msra.mxu1 %v887_v43 }
 0x156   :  { %v212_v49 = vmul.f32 1.0614054, %v934_v46  ;;  %v936_v3 = vpop.eup %935 }
 0x157   :  { %v215_v50 = vadd.f32 -1.4531521, %v213_v48  ;;  %v938_v5 = vpop.eup %937 }
 0x158   :  { %v214_v52 = vadd.f32 -1.4531521, %v212_v49 }
 0x159   :  { %v217_v54 = vmul.f32 %v932_v44, %v215_v50 }
 0x15a   :  { %v216_v55 = vmul.f32 %v934_v46, %v214_v52 }
 0x15b   :  { %v219_v56 = vadd.f32 1.4214138, %v217_v54 }
 0x15c   :  { %v218_v57 = vadd.f32 1.4214138, %v216_v55 }
 0x15d   :  { %v221_v58 = vmul.f32 %v932_v44, %v219_v56 }
 0x15e   :  { %v220_v59 = vmul.f32 %v934_v46, %v218_v57 }
 0x15f   :  { %v223_v60 = vadd.f32 -0.28449672, %v221_v58 }
 0x160   :  { %v222_v61 = vadd.f32 -0.28449672, %v220_v59 }
 0x161   :  { %v225_v62 = vmul.f32 %v932_v44, %v223_v60  ;;  %v662_v60 = vld [vmem:[%s1292_s3] ss:$0 sm:$0xff] }
 0x162   :  { %v224_v63 = vmul.f32 %v934_v46, %v222_v61 }
 0x163   :  { %v227_v0 = vadd.f32 0.2548296, %v225_v62  ;;  %v663_v62 = vld [vmem:[%s1293_s4] ss:$0 sm:$0xff] }
 0x164   :  { %v226_v1 = vadd.f32 0.2548296, %v224_v63 }
 0x165   :  { %v229_v2 = vmul.f32 %v932_v44, %v227_v0 }
 0x166   :  { %v228_v4 = vmul.f32 %v934_v46, %v226_v1 }
 0x167   :  { %v239_v6 = vmul.f32 %v936_v3, %v229_v2 }
 0x168   :  { %v238_v7 = vmul.f32 %v938_v5, %v228_v4 }
 0x169   :  { %v241_v8 = vsub.f32 1.0, %v239_v6  ;;  %v488_v6 = vld [vmem:[#allocation8] sm:$0xff] }
 0x16a   :  { %v240_v11 = vsub.f32 1.0, %v238_v7  ;;  %v489_v7 = vld [vmem:[#allocation8 + $0x8] sm:$0xff] }
 0x16b   :  { %v243_v13 = vmul.f32 %v241_v8, %v201_v10  ;;  %v891_v8 = vpack.c.bf16 %v489_v7, %v488_v6  ;;  %v664_v10 = vld [vmem:[%s1295_s6] ss:$0 sm:$0xff]  ;;  %v492_v6 = vld [vmem:[#allocation8 + $0x20] sm:$0xff]  ;;  %v493_v7 = vld [vmem:[#allocation8 + $0x28] sm:$0xff] }
 0x16c   :  { %v242_v14 = vmul.f32 %v240_v11, %v200_v12 }
 0x16d   :  { %v245_v17 = vadd.f32 1.0, %v243_v13  ;;  %892 = vmatprep.subr.bf16.mxu0 %v891_v8 }
 0x16e   :  { %v244_v16 = vadd.f32 1.0, %v242_v14  ;;  %894 = vmatpush3.bf16.msra.mxu0 %v891_v8  ;;  %v899_v8 = vpack.c.bf16 %v493_v7, %v492_v6 }
 0x16f   :  { %v1233_v21 = vmul.f32 %v245_v17, %v195_v18 }
 0x170   :  { %v1228_v19 = vmul.f32 %v244_v16, %v194_v15 }
 0x171   :  { %v255_v22 = vmul.f32 %v1233_v21, %v1233_v21 }
 0x172   :  { %250 = vadd.xlane.f32.xlu0 %v1228_v19  ;;  %v254_v20 = vmul.f32 %v1228_v19, %v1228_v19 }
 0x174   :  { %256 = vadd.xlane.f32.xlu1 %v254_v20 }
 0x176   :  { %252 = vadd.xlane.f32.xlu0 %v1233_v21 }
 0x178   :  { %258 = vadd.xlane.f32.xlu1 %v255_v22 }
 0x1ff   :  { %v251_v44 = vpop.xlane.xlu0 %250 }
 0x200   :  { %v260_v45 = vmul.f32 0.015625, %v251_v44 }
 0x201   :  { %v257_v46 = vpop.xlane.xlu1 %256 }
 0x202   :  { %v264_v47 = vmul.f32 %v260_v45, %v260_v45  ;;  %v262_v48 = vmul.f32 0.015625, %v257_v46  ;;  %v268_v58 = vsub.f32 %v1228_v19, %v260_v45 }
 0x203   :  { %v253_v49 = vpop.xlane.xlu0 %252 }
 0x204   :  { %v266_v50 = vsub.f32 %v262_v48, %v264_v47  ;;  %v261_v51 = vmul.f32 0.015625, %v253_v49 }
 0x205   :  { %v259_v52 = vpop.xlane.xlu1 %258 }
 0x206   :  { %v270_v53 = vadd.f32 1e-05, %v266_v50  ;;  %v265_v54 = vmul.f32 %v261_v51, %v261_v51  ;;  %v263_v55 = vmul.f32 0.015625, %v259_v52  ;;  %v269_v63 = vsub.f32 %v1233_v21, %v261_v51 }
 0x208   :  { %939 = vrsqrt.f32 %v270_v53  ;;  %v267_v56 = vsub.f32 %v263_v55, %v265_v54 }
 0x20a   :  { %v271_v57 = vadd.f32 1e-05, %v267_v56 }
 0x20c   :  { %941 = vrsqrt.f32 %v271_v57 }
 0x212   :  { %v940_v59 = vpop.eup %939 }
 0x213   :  { %v274_v61 = vmul.f32 %v940_v59, %v268_v58 }
 0x215   :  { %v282_v0 = vmul.f32 %v662_v60, %v274_v61 }
 0x216   :  { %v942_v1 = vpop.eup %941 }
 0x217   :  { %v275_v2 = vmul.f32 %v942_v1, %v269_v63  ;;  %v290_v3 = vadd.f32 %v663_v62, %v282_v0 }
 0x219   :  { %v283_v4 = vmul.f32 %v662_v60, %v275_v2  ;;  %789 = vmatprep.mubr.f32.mxu1 %v290_v3  ;;  %v490_v3 = vld [vmem:[#allocation8 + $0x10] sm:$0xff] }
 0x21b   :  { %v291_v5 = vadd.f32 %v663_v62, %v283_v4  ;;  %v491_v4 = vld [vmem:[#allocation8 + $0x18] sm:$0xff] }
 0x21d   :  { %790 = vmatmul.mubr.f32.vlgmr.msra.gmra.mrb[0].mxu1 %v291_v5  ;;  %v895_v5 = vpack.c.bf16 %v491_v4, %v490_v3 }
 0x21f   :  { %896 = vmatprep.subr.bf16.mxu0 %v895_v5 }
 0x220   :  { %898 = vmatpush3.bf16.msra.mxu0 %v895_v5 }
 0x221   :  { %900 = vmatprep.subr.bf16.mxu0 %v899_v8 }
 0x224   :  { %902 = vmatpush3.bf16.msra.mxu0 %v899_v8 }
 0x2f0   :  { %v791_v11 = vpop.f32.mrb[0].mxu1 }
 0x2f1   :  { %v387_v12 = vadd.f32 %v791_v11, %v664_v10  ;;  %v381_v13 = vpop.f32.mrb[1].mxu1  ;;  %v495_v11 = vld [vmem:[#allocation8 + $0x38] sm:$0xff] }
 0x2f2   :  { %v382_v14 = vadd.f32 %v664_v10, %v381_v13  ;;  %v494_v10 = vld [vmem:[#allocation8 + $0x30] sm:$0xff]  ;;  %v496_v13 = vld [vmem:[#allocation8 + $0x40] sm:$0xff] }
 0x2f3   :  { %v393_v15 = vmul.f32 0.70710677, %v387_v12  ;;  %v391_v59 = vmul.f32 0.5, %v387_v12  ;;  %v903_v12 = vpack.c.bf16 %v495_v11, %v494_v10 }
 0x2f4   :  { %v392_v16 = vmul.f32 0.70710677, %v382_v14  ;;  %v390_v61 = vmul.f32 0.5, %v382_v14  ;;  %v497_v14 = vld [vmem:[#allocation8 + $0x48] sm:$0xff] }
 0x2f5   :  { %v399_v17 = vand.u32 2147483647, %v393_v15  ;;  %vm395_vm2 = vcmp.lt.f32.partialorder %v393_v15, 0.0  ;;  %904 = vmatprep.subr.bf16.mxu0 %v903_v12  ;;  %v907_v15 = vpack.c.bf16 %v497_v14, %v496_v13 }
 0x2f6   :  { %v398_v18 = vand.u32 2147483647, %v392_v16  ;;  %vm394_vm3 = vcmp.lt.f32.partialorder %v392_v16, 0.0  ;;  %v397_v54 = vsel %vm395_vm2, -1.0, %v1087_v9  ;;  %906 = vmatpush3.bf16.msra.mxu0 %v903_v12  ;;  %v498_v16 = vld [vmem:[#allocation8 + $0x50] sm:$0xff] }
 0x2f7   :  { %v401_v19 = vmul.f32 0.3275911, %v399_v17  ;;  %v427_v23 = vsub.f32 0.0, %v399_v17  ;;  %v396_v56 = vsel %vm394_vm3, -1.0, %v1087_v9  ;;  %908 = vmatprep.subr.bf16.mxu0 %v907_v15 }
 0x2f8   :  { %v400_v20 = vmul.f32 0.3275911, %v398_v18  ;;  %v426_v24 = vsub.f32 0.0, %v398_v18 }
 0x2f9   :  { %v403_v21 = vadd.f32 1.0, %v401_v19  ;;  %v429_v26 = vmul.f32 %v427_v23, %v399_v17  ;;  %v499_v17 = vld [vmem:[#allocation8 + $0x58] sm:$0xff]  ;;  %v500_v19 = vld [vmem:[#allocation8 + $0x60] sm:$0xff] }
 0x2fa   :  { %v402_v22 = vadd.f32 1.0, %v400_v20  ;;  %v428_v28 = vmul.f32 %v426_v24, %v398_v18  ;;  %v911_v18 = vpack.c.bf16 %v499_v17, %v498_v16  ;;  %v501_v20 = vld [vmem:[#allocation8 + $0x68] sm:$0xff]  ;;  %910 = vmatpush3.bf16.msra.mxu0 %v907_v15  ;;  %v503_v23 = vld [vmem:[#allocation8 + $0x78] sm:$0xff] }
 0x2fb   :  { %943 = vrcp.f32 %v403_v21  ;;  %v432_v32 = vmul.f32 1.442695, %v429_v26  ;;  %v915_v21 = vpack.c.bf16 %v501_v20, %v500_v19 }
 0x2fc   :  { %945 = vrcp.f32 %v402_v22  ;;  %v430_v34 = vmul.f32 1.442695, %v428_v28  ;;  %912 = vmatprep.subr.bf16.mxu0 %v911_v18  ;;  %v502_v22 = vld [vmem:[#allocation8 + $0x70] sm:$0xff] }
 0x2fd   :  { %947 = vpow2.f32 %v432_v32  ;;  %v919_v24 = vpack.c.bf16 %v503_v23, %v502_v22 }
 0x2fe   :  { %949 = vpow2.f32 %v430_v34  ;;  %914 = vmatpush3.bf16.msra.mxu0 %v911_v18 }
 0x2ff   :  { %916 = vmatprep.subr.bf16.mxu0 %v915_v21 }
 0x302   :  { %918 = vmatpush3.bf16.msra.mxu0 %v915_v21 }
 0x303   :  { %920 = vmatprep.subr.bf16.mxu0 %v919_v24 }
 0x305   :  { %v944_v25 = vpop.eup %943 }
 0x306   :  { %v946_v27 = vpop.eup %945  ;;  %v409_v29 = vmul.f32 1.0614054, %v944_v25  ;;  %922 = vmatpush3.bf16.msra.mxu0 %v919_v24 }
 0x307   :  { %v408_v30 = vmul.f32 1.0614054, %v946_v27  ;;  %v948_v48 = vpop.eup %947 }
 0x308   :  { %v411_v31 = vadd.f32 -1.4531521, %v409_v29  ;;  %v950_v50 = vpop.eup %949 }
 0x309   :  { %v410_v33 = vadd.f32 -1.4531521, %v408_v30 }
 0x30a   :  { %v413_v35 = vmul.f32 %v944_v25, %v411_v31 }
 0x30b   :  { %v412_v36 = vmul.f32 %v946_v27, %v410_v33 }
 0x30c   :  { %v415_v37 = vadd.f32 1.4214138, %v413_v35 }
 0x30d   :  { %v414_v38 = vadd.f32 1.4214138, %v412_v36 }
 0x30e   :  { %v417_v39 = vmul.f32 %v944_v25, %v415_v37 }
 0x30f   :  { %v416_v40 = vmul.f32 %v946_v27, %v414_v38 }
 0x310   :  { %v419_v41 = vadd.f32 -0.28449672, %v417_v39 }
 0x311   :  { %v418_v42 = vadd.f32 -0.28449672, %v416_v40 }
 0x312   :  { %v421_v43 = vmul.f32 %v944_v25, %v419_v41 }
 0x313   :  { %v420_v44 = vmul.f32 %v946_v27, %v418_v42  ;;  %v665_v42 = vld [vmem:[%s1296_s7] ss:$0 sm:$0xff]  ;;  %s1088_s7 = smov [#allocation10]  }
 0x314   :  { %v423_v45 = vadd.f32 0.2548296, %v421_v43 }
 0x315   :  { %v422_v46 = vadd.f32 0.2548296, %v420_v44 }
 0x316   :  { %v425_v47 = vmul.f32 %v944_v25, %v423_v45 }
 0x317   :  { %v424_v49 = vmul.f32 %v946_v27, %v422_v46  ;;  %v666_v46 = vld [vmem:[%s1297_s8] ss:$0 sm:$0xff]  ;;  %s647_s8 = sshll.u32 %s1088_s7, 4  ;;  %s648_s8 = int_to_ptr.vmem [resolvable:$true] %s647_s8 }
 0x318   :  { %v435_v51 = vmul.f32 %v948_v48, %v425_v47  ;;  %p1056_p5 = scmp.lt.s32.totalorder %s648_s8, %s648_s8 }
 0x319   :  { %v434_v52 = vmul.f32 %v950_v50, %v424_v49 }
 0x31a   :  { %v437_v53 = vsub.f32 1.0, %v435_v51  ;;  %v667_v51 = vld [vmem:[%s1299_s10] ss:$0 sm:$0xff]  ;;  %s1051_s10 = scalar_lea.vmem %s648_s8, 256 }
 0x31b   :  { %v436_v55 = vsub.f32 1.0, %v434_v52  ;;  %p1052_p4 = scmp.ne.s32.totalorder %s648_s8, %s1051_s10  ;;  %p1057_p6 = scmp.lt.s32.totalorder %s1051_s10, %s1051_s10 }
 0x31c   :  { %v439_v57 = vmul.f32 %v437_v53, %v397_v54 }
 0x31d   :  { %v438_v58 = vmul.f32 %v436_v55, %v396_v56  ;;  %p1058_p7 = por %p1057_p6, %p1056_p5 }
 0x31e   :  { %v441_v60 = vadd.f32 1.0, %v439_v57 }
 0x31f   :  { %v440_v62 = vadd.f32 1.0, %v438_v58  ;;  %p1059_p8 = pnand %p1058_p7, %p1052_p4 }
 0x320   :  { %v1251_v63 = vmul.f32 %v441_v60, %v391_v59 }
 0x321   :  { %v1253_v0 = vmul.f32 %v440_v62, %v390_v61 }
 0x322   :  { %448 = vadd.xlane.f32.xlu1 %v1251_v63  ;;  %v451_v1 = vmul.f32 %v1251_v63, %v1251_v63 }
 0x323   :  { %446 = vadd.xlane.f32.xlu0 %v1253_v0  ;;  %v450_v2 = vmul.f32 %v1253_v0, %v1253_v0 }
 0x326   :  { %454 = vadd.xlane.f32.xlu1 %v451_v1 }
 0x327   :  { %452 = vadd.xlane.f32.xlu0 %v450_v2 }
 0x3af   :  { %v449_v25 = vpop.xlane.xlu1 %448 }
 0x3b0   :  { %v457_v26 = vmul.f32 0.015625, %v449_v25  ;;  %v447_v27 = vpop.xlane.xlu0 %446 }
 0x3b1   :  { %v456_v28 = vmul.f32 0.015625, %v447_v27 }
 0x3b2   :  { %v461_v30 = vmul.f32 %v457_v26, %v457_v26  ;;  %v465_v39 = vsub.f32 %v1251_v63, %v457_v26 }
 0x3b3   :  { %v455_v29 = vpop.xlane.xlu1 %454  ;;  %v460_v33 = vmul.f32 %v456_v28, %v456_v28  ;;  %v464_v41 = vsub.f32 %v1253_v0, %v456_v28 }
 0x3b4   :  { %v459_v31 = vmul.f32 0.015625, %v455_v29  ;;  %v453_v32 = vpop.xlane.xlu0 %452 }
 0x3b5   :  { %v458_v34 = vmul.f32 0.015625, %v453_v32 }
 0x3b6   :  { %v463_v35 = vsub.f32 %v459_v31, %v461_v30 }
 0x3b7   :  { %v462_v36 = vsub.f32 %v458_v34, %v460_v33 }
 0x3b8   :  { %v467_v37 = vadd.f32 1e-05, %v463_v35 }
 0x3b9   :  { %v466_v38 = vadd.f32 1e-05, %v462_v36 }
 0x3ba   :  { %951 = vrsqrt.f32 %v467_v37 }
 0x3bb   :  { %953 = vrsqrt.f32 %v466_v38 }
 0x3c4   :  { %v952_v40 = vpop.eup %951 }
 0x3c5   :  { %v954_v43 = vpop.eup %953  ;;  %v471_v44 = vmul.f32 %v952_v40, %v465_v39 }
 0x3c6   :  { %v470_v45 = vmul.f32 %v954_v43, %v464_v41 }
 0x3c7   :  { %v479_v47 = vmul.f32 %v665_v42, %v471_v44 }
 0x3c8   :  { %v478_v48 = vmul.f32 %v665_v42, %v470_v45 }
 0x3c9   :  { %v487_v50 = vadd.f32 %v666_v46, %v479_v47 }
 0x3ca   :  { %v486_v49 = vadd.f32 %v666_v46, %v478_v48 }
 0x3cc   :  { %824 = vmatprep.mubr.f32.mxu0 %v486_v49 }
 0x3cd   :  { %825 = vmatmul.mubr.f32.vlgmr.msra.gmra.mrb[2].mxu0 %v487_v50 }
 0x4a0   :  { %v826_v52 = vpop.f32.mrb[2].mxu0 }
 0x4a1   :  { %v583_v53 = vadd.f32 %v826_v52, %v667_v51  ;;  %v577_v54 = vpop.f32.mrb[3].mxu0 }
 0x4a2   :  { %v578_v55 = vadd.f32 %v667_v51, %v577_v54 }
 0x4a3   :  { %v589_v56 = vmul.f32 0.70710677, %v583_v53  ;;  %v587_v37 = vmul.f32 0.5, %v583_v53 }
 0x4a4   :  { %v588_v57 = vmul.f32 0.70710677, %v578_v55  ;;  %v586_v39 = vmul.f32 0.5, %v578_v55 }
 0x4a5   :  { %v595_v58 = vand.u32 2147483647, %v589_v56  ;;  %vm591_vm4 = vcmp.lt.f32.partialorder %v589_v56, 0.0 }
 0x4a6   :  { %v594_v59 = vand.u32 2147483647, %v588_v57  ;;  %vm590_vm5 = vcmp.lt.f32.partialorder %v588_v57, 0.0  ;;  %v593_v32 = vsel %vm591_vm4, -1.0, %v1087_v9 }
 0x4a7   :  { %v597_v60 = vmul.f32 0.3275911, %v595_v58  ;;  %v623_v0 = vsub.f32 0.0, %v595_v58  ;;  %v592_v35 = vsel %vm590_vm5, -1.0, %v1087_v9 }
 0x4a8   :  { %v596_v61 = vmul.f32 0.3275911, %v594_v59  ;;  %v622_v1 = vsub.f32 0.0, %v594_v59 }
 0x4a9   :  { %v599_v62 = vadd.f32 1.0, %v597_v60  ;;  %v625_v3 = vmul.f32 %v623_v0, %v595_v58 }
 0x4aa   :  { %v598_v63 = vadd.f32 1.0, %v596_v61  ;;  %v624_v6 = vmul.f32 %v622_v1, %v594_v59 }
 0x4ab   :  { %955 = vrcp.f32 %v599_v62  ;;  %v628_v10 = vmul.f32 1.442695, %v625_v3 }
 0x4ac   :  { %957 = vrcp.f32 %v598_v63  ;;  %v626_v13 = vmul.f32 1.442695, %v624_v6 }
 0x4ad   :  { %959 = vpow2.f32 %v628_v10 }
 0x4ae   :  { %961 = vpow2.f32 %v626_v13 }
 0x4b5   :  { %v956_v2 = vpop.eup %955 }
 0x4b6   :  { %v958_v4 = vpop.eup %957  ;;  %v605_v5 = vmul.f32 1.0614054, %v956_v2 }
 0x4b7   :  { %v604_v7 = vmul.f32 1.0614054, %v958_v4  ;;  %v960_v26 = vpop.eup %959 }
 0x4b8   :  { %v607_v8 = vadd.f32 -1.4531521, %v605_v5  ;;  %v962_v28 = vpop.eup %961 }
 0x4b9   :  { %v606_v11 = vadd.f32 -1.4531521, %v604_v7 }
 0x4ba   :  { %v609_v12 = vmul.f32 %v956_v2, %v607_v8 }
 0x4bb   :  { %v608_v14 = vmul.f32 %v958_v4, %v606_v11 }
 0x4bc   :  { %v611_v15 = vadd.f32 1.4214138, %v609_v12 }
 0x4bd   :  { %v610_v16 = vadd.f32 1.4214138, %v608_v14 }
 0x4be   :  { %v613_v17 = vmul.f32 %v956_v2, %v611_v15 }
 0x4bf   :  { %v612_v18 = vmul.f32 %v958_v4, %v610_v16 }
 0x4c0   :  { %v615_v19 = vadd.f32 -0.28449672, %v613_v17 }
 0x4c1   :  { %v614_v20 = vadd.f32 -0.28449672, %v612_v18 }
 0x4c2   :  { %v617_v21 = vmul.f32 %v956_v2, %v615_v19 }
 0x4c3   :  { %v616_v22 = vmul.f32 %v958_v4, %v614_v20 }
 0x4c4   :  { %v619_v23 = vadd.f32 0.2548296, %v617_v21 }
 0x4c5   :  { %v618_v24 = vadd.f32 0.2548296, %v616_v22 }
 0x4c6   :  { %v621_v25 = vmul.f32 %v956_v2, %v619_v23 }
 0x4c7   :  { %v620_v27 = vmul.f32 %v958_v4, %v618_v24 }
 0x4c8   :  { %v631_v29 = vmul.f32 %v960_v26, %v621_v25 }
 0x4c9   :  { %v630_v30 = vmul.f32 %v962_v28, %v620_v27 }
 0x4ca   :  { %v633_v31 = vsub.f32 1.0, %v631_v29 }
 0x4cb   :  { %v632_v33 = vsub.f32 1.0, %v630_v30 }
 0x4cc   :  { %v635_v34 = vmul.f32 %v633_v31, %v593_v32 }
 0x4cd   :  { %v634_v36 = vmul.f32 %v632_v33, %v592_v35 }
 0x4ce   :  { %v637_v38 = vadd.f32 1.0, %v635_v34 }
 0x4cf   :  { %v636_v40 = vadd.f32 1.0, %v634_v36 }
 0x4d0   :  { %v639_v41 = vmul.f32 %v637_v38, %v587_v37 }
 0x4d1   :  { %v638_v42 = vmul.f32 %v636_v40, %v586_v39 }
 0x4d2   :  { %641 = vst [vmem:[#allocation10 + $0x8] sm:$0xff] %v639_v41 }
 0x4d3   :  { %640 = vst [vmem:[#allocation10] sm:$0xff] %v638_v42 }
 0x4d4   :  { %1062 = shalt.err (!%p1059_p8)
}
 0x4d5   :  { %s1063_s22 = scalar_lea.hbm %s1300_s11, 256 }
 0x4d6   :  { %p1064_p9 = scmp.ne.s32.totalorder %s1300_s11, %s1063_s22  ;;  %p1067_p10 = scmp.lt.u32.totalorder %s1063_s22, %s1300_s11 }
 0x4d8   :  { %p1069_p11 = pnand %p1067_p10, %p1064_p9 }
 0x4da   :  { %1072 = shalt.err (!%p1069_p11)
}
 0x4db   :  { %653 = dma.vmem_to_hbm [thread:$0]  %s648_s8, 256, %s1300_s11, [#allocation4], %s1083_s29, %s1083_s29, %s1084_s30  }
 0x4dc   :  { %1079 = dma.done.wait [#allocation4], 256  }
 0x4dd   :  { %1080 = vsyncadd [#allocation4], 4294967040 }
 0x4de   :  { %657 = vsyncpa [#allocation3], 1 }
 0x4df   :  { %658 = vsyncpa [#allocation6], 1 }
 0x4e0   :  { %659 = vsyncpa [#allocation9], 1 }
 0x4e1   :  { %660 = vsyncpa [#allocation4], 1 }

</bundles_post_ra>
